<compile_context>
chip_gen: v7x
topology: tpu7x:2x2x1
jax: 0.10.0
libtpu: 0.0.40
codegen_flags: <defaults>
</compile_context>

<pallas_src>
import functools

import jax
import jax.numpy as jnp
from jax.experimental import pallas as pl
from jax.experimental.pallas import tpu as pltpu

N_IMAGES = 3
N_FIGURES = 3
N_ATTRS = 2                                 # shape, color
N_CLASSES = 3                               # 3 shapes / 3 colors
D_OUT = N_FIGURES * N_ATTRS * N_CLASSES     # 18 logits per image
HIDDEN = 32
OUT_LANES = 128                             # lane-dense output slab width


# --------------------------------------------------------------------------
# Pallas kernel: fused block-diagonal 2-layer MLP over all n_images at once.
# --------------------------------------------------------------------------
def _encoder_kernel(x_ref, w1_ref, b1_ref, w2_ref, b2_ref, out_ref):
    # x: (TILE_B, C*H*W_total) -- whole sample rows (all n_images at once).
    # TODO(synk): if the upstream producer can emit x in bf16 the input read
    # (the dominant HBM term, ~9.2 KB/row) halves; the in-kernel cast below
    # stays free either way.
    x = x_ref[...].astype(jnp.bfloat16)

    # Fused first layer: one bf16 MXU matmul -> all images' hidden units.
    h = jnp.dot(x, w1_ref[...], preferred_element_type=jnp.float32)
    h = jnp.maximum(h + b1_ref[...], 0.0).astype(jnp.bfloat16)   # (TILE_B, ni*hid)

    # Fused second layer: one bf16 MXU matmul emits a single lane-dense
    # (TILE_B, 128) slab; lane i*18 + f*6 + a*3 + c holds the class-c logit of
    # (image i, figure f, attribute a) -- the module's native CS layout.
    # Lanes >= 54 are zero-padded weight columns (unmasked vst store).
    out_ref[...] = (jnp.dot(h, w2_ref[...], preferred_element_type=jnp.float32)
                    + b2_ref[...])


def encoder_pallas(x_flat, w1_big, b1_big, w2_big, b2_big, *, tile_b):
    n, d_in = x_flat.shape
    hid_all = w1_big.shape[1]
    grid = (pl.cdiv(n, tile_b),)
    return pl.pallas_call(
        _encoder_kernel,
        grid=grid,
        in_specs=[
            pl.BlockSpec((tile_b, d_in), lambda i: (i, 0)),
            # NOTE: the four weight/bias operands are grid-invariant (constant
            # index_map) so their DMAs are elided after step 0; single
            # buffering them would only reclaim ~0.5 MiB of VMEM, so it is not
            # worth the extra pipeline_mode plumbing here.
            pl.BlockSpec((d_in, hid_all), lambda i: (0, 0)),
            pl.BlockSpec((1, hid_all), lambda i: (0, 0)),
            pl.BlockSpec((hid_all, OUT_LANES), lambda i: (0, 0)),
            pl.BlockSpec((1, OUT_LANES), lambda i: (0, 0)),
        ],
        out_specs=pl.BlockSpec((tile_b, OUT_LANES), lambda i: (i, 0)),
        out_shape=jax.ShapeDtypeStruct((n, OUT_LANES), jnp.float32),
        compiler_params=pltpu.CompilerParams(
            dimension_semantics=("parallel",),
            # 512-row tile => ~13 MiB double-buffered working set: above v5e's
            # 16 MiB default scoped VMEM, comfortably under 48 MiB on every
            # generation (v7x physical VMEM is 64 MiB).
            vmem_limit_bytes=48 * 1024 * 1024),
    )(x_flat, w1_big, b1_big, w2_big, b2_big)


# --------------------------------------------------------------------------
# Weight fusion: scatter the shared per-image encoder weights so the kernel
# can read x with a zero-copy flatten (no HBM transpose of activations) and
# emit all logits from a single layer-2 matmul in the module's CS layout.
# --------------------------------------------------------------------------
def _fuse_params(w1, b1, w2, b2, n_images, img_w):
    d_img, hid = w1.shape
    ch = d_img // img_w
    d_out = w2.shape[1]
    n_pack = n_images * d_out                 # 54 useful output lanes
    eye = jnp.eye(n_images, dtype=w1.dtype)

    # Layer 1: (C*H*W_total, n_images*hidden), block-diagonal over images and
    # interleaved along rows exactly like the flattened NCHW layout of x
    # (row index = (c*H + h)*W_total + image*img_w + wi).
    w1_r = w1.reshape(ch, img_w, hid)                               # (j, w, k)
    w1_big = jnp.einsum("jwk,ip->jiwpk", w1_r, eye)
    w1_big = w1_big.reshape(ch * n_images * img_w, n_images * hid)
    b1_big = jnp.tile(b1.reshape(1, hid), (1, n_images))

    # Layer 2: block-diagonal over images, (n_images*hidden, n_images*18);
    # column i*18 + j holds image i's logit j (= figure*6 + attr*3 + class),
    # i.e. exactly the flattened CS layout. Padded to 128 lanes.
    w2_big = jnp.einsum("kd,ip->ikpd", w2, eye)
    w2_big = w2_big.reshape(n_images * hid, n_pack)
    w2_big = jnp.pad(w2_big, ((0, 0), (0, OUT_LANES - n_pack)))
    b2_big = jnp.tile(b2.reshape(1, d_out), (1, n_images))
    b2_big = jnp.pad(b2_big, ((0, 0), (0, OUT_LANES - n_pack)))

    return (w1_big.astype(jnp.bfloat16), b1_big.astype(jnp.float32),
            w2_big.astype(jnp.bfloat16), b2_big.astype(jnp.float32))


# --------------------------------------------------------------------------
# Tiny boolean same / diff pattern logic (matches the torch reference).
# --------------------------------------------------------------------------
def _same(preds):
    s = jnp.all(preds == preds[:, :, 0:1], axis=2, keepdims=True)   # (B, ni, 1)
    return jnp.all(s, axis=1)                                        # (B, 1)


def _diff(preds):
    d = ((preds[:, :, 0] != preds[:, :, 1]) &
         (preds[:, :, 0] != preds[:, :, 2]) &
         (preds[:, :, 1] != preds[:, :, 2]))                         # (B, ni)
    return jnp.all(d, axis=1, keepdims=True)                        # (B, 1)


def _kand_logic(shape_preds, color_preds):
    flags = jnp.concatenate([_same(shape_preds), _same(color_preds),
                             _diff(shape_preds), _diff(color_preds)], axis=1)
    return jnp.any(flags, axis=1).astype(jnp.int32)                 # (B,)


# --------------------------------------------------------------------------
# Forward pass
# --------------------------------------------------------------------------
def _pick_tile_b(b):
    """Batch tile: big (amortize ~0.35us/step, keep the HBM pipe full) but
    capped so the 'parallel' grid has >= 2 steps whenever the batch allows it
    (v7x shards the parallel axis across its 2 TensorCores)."""
    b8 = 8 * pl.cdiv(b, 8)                    # batch rounded to the sublane quantum
    tile = min(512, b8)
    if tile == b8 and b8 >= 16:               # whole batch in one step -> split in 2
        tile = 8 * pl.cdiv(b8 // 8, 2)
    return tile


@functools.partial(jax.jit, static_argnames=("n_images",))
def _kand_core(x, w1, b1, w2, b2, n_images=N_IMAGES):
    b, c, hgt, w_total = x.shape
    img_w = w_total // n_images
    n_pack = n_images * D_OUT
    assert n_pack <= OUT_LANES

    # Zero-copy flatten: pure row-major reshape, no HBM transpose of x.
    x_flat = x.reshape(b, c * hgt * w_total)

    w1_big, b1_big, w2_big, b2_big = _fuse_params(w1, b1, w2, b2, n_images, img_w)

    slab = encoder_pallas(x_flat, w1_big, b1_big, w2_big, b2_big,
                          tile_b=_pick_tile_b(b))

    # Tiny epilogue on the 54 useful lanes (O(B*54) elements): grouped softmax,
    # argmax and the same/diff pattern logic, exactly as in the torch module.
    cs = slab[:, :n_pack].reshape(b, n_images, D_OUT)
    res = cs.reshape(b, n_images, N_FIGURES, N_ATTRS, N_CLASSES)
    pcs = jax.nn.softmax(res, axis=-1).reshape(
        b, n_images, N_FIGURES, N_ATTRS * N_CLASSES)
    preds_fa = jnp.argmax(res, axis=-1)       # argmax(probs) == argmax(logits)
    preds = _kand_logic(preds_fa[..., 0], preds_fa[..., 1])

    # TODO(synk): torch.nn.functional.one_hot with no num_classes infers the
    # width from max(preds)+1 (data-dependent shape, forces a host sync); preds
    # is boolean here, so a fixed width of 2 keeps the output shape static.
    ys = jax.nn.one_hot(preds, 2, dtype=jnp.int32)
    return cs, pcs, ys


def kand_forward(x, params, n_images=N_IMAGES):
    cs, pcs, ys = _kand_core(x, *params, n_images=n_images)
    return {"CS": cs, "pCS": pcs, "YS": ys}


def init_params(key, d_in, hidden=HIDDEN, d_out=D_OUT):
    k1, k2, k3, k4 = jax.random.split(key, 4)
    w1 = jax.random.normal(k1, (d_in, hidden), jnp.float32) / jnp.sqrt(d_in)
    b1 = 0.01 * jax.random.normal(k2, (1, hidden), jnp.float32)
    w2 = jax.random.normal(k3, (hidden, d_out), jnp.float32) / jnp.sqrt(hidden)
    b2 = 0.01 * jax.random.normal(k4, (1, d_out), jnp.float32)
    return w1, b1, w2, b2


# --------------------------------------------------------------------------
# Pure-JAX reference (mirrors the PyTorch module: per-image split + shared
# encoder; same bf16 matmul inputs / f32 accumulation as the kernel).
# --------------------------------------------------------------------------
def reference_forward(x, params, n_images=N_IMAGES):
    w1, b1, w2, b2 = params
    b = x.shape[0]
    xs = jnp.split(x, n_images, axis=-1)
    cs = []
    for xi in xs:
        xf = xi.reshape(b, -1).astype(jnp.bfloat16)
        h = jnp.dot(xf, w1.astype(jnp.bfloat16),
                    preferred_element_type=jnp.float32) + b1
        h = jnp.maximum(h, 0.0).astype(jnp.bfloat16)
        lc = jnp.dot(h, w2.astype(jnp.bfloat16),
                     preferred_element_type=jnp.float32) + b2
        cs.append(lc)
    cs = jnp.stack(cs, axis=1)                               # (B, ni, 18)
    res = cs.reshape(b, n_images, N_FIGURES, N_ATTRS * N_CLASSES)
    shape_probs = jax.nn.softmax(res[..., :3], axis=-1)
    color_probs = jax.nn.softmax(res[..., 3:], axis=-1)
    pcs = jnp.concatenate([shape_probs, color_probs], axis=-1)
    preds = _kand_logic(jnp.argmax(shape_probs, axis=-1),
                        jnp.argmax(color_probs, axis=-1))
    ys = jax.nn.one_hot(preds, 2, dtype=jnp.int32)
    return cs, pcs, ys


if __name__ == "__main__":
    key = jax.random.PRNGKey(0)
    kx, kp = jax.random.split(key)

    B, C, H, Wimg = 2, 3, 16, 16
    x = jax.random.normal(kx, (B, C, H, Wimg * N_IMAGES), jnp.float32)   # NCHW
    params = init_params(kp, d_in=C * H * Wimg)

    out = kand_forward(x, params)
    out = jax.tree_util.tree_map(jax.block_until_ready, out)

    # shapes
    assert out["CS"].shape == (B, N_IMAGES, D_OUT)
    assert out["pCS"].shape == (B, N_IMAGES, N_FIGURES, N_ATTRS * N_CLASSES)
    assert out["YS"].shape == (B, 2)

    # pure-JAX reference check of logits / probabilities
    ref_cs, ref_pcs, ref_ys = reference_forward(x, params)
    assert jnp.allclose(out["CS"], ref_cs, atol=3e-2, rtol=3e-2), "CS mismatch"
    assert jnp.allclose(out["pCS"], ref_pcs, atol=3e-2, rtol=3e-2), "pCS mismatch"
    # each softmax group of 3 sums to 1 -> last dim (6) sums to 2
    assert jnp.allclose(jnp.sum(out["pCS"], axis=-1), 2.0, atol=2e-2)

    # prediction path must be self-consistent with the returned probabilities
    # (validates the lane -> (image, figure, attr, class) unpacking and YS).
    sp = jnp.argmax(out["pCS"][..., :3], axis=-1)
    cp = jnp.argmax(out["pCS"][..., 3:], axis=-1)
    ys_check = jax.nn.one_hot(_kand_logic(sp, cp), 2, dtype=jnp.int32)
    assert jnp.array_equal(out["YS"], ys_check)

    print("KERNEL_OK")
</pallas_src>

<mosaic_0001>
module attributes {stable_mosaic.version = 11 : i64} {
  func.func @_encoder_kernel(%arg0: i32, %arg1: memref<8x2304xf32, #tpu.memory_space<vmem>>, %arg2: memref<2304x96xbf16, #tpu.memory_space<vmem>>, %arg3: memref<1x96xf32, #tpu.memory_space<vmem>>, %arg4: memref<96x128xbf16, #tpu.memory_space<vmem>>, %arg5: memref<1x128xf32, #tpu.memory_space<vmem>>, %arg6: memref<8x128xf32, #tpu.memory_space<vmem>>) attributes {dimension_semantics = [#tpu.dimension_semantics<parallel>], iteration_bounds = array<i64: 1>, scalar_prefetch = 0 : i64, scratch_operands = 0 : i64, tpu.core_type = #tpu.core_type<tc>, window_params = [{transform_indices = @transform_0, window_bounds = array<i64: 8, 2304>}, {pipeline_mode = #tpu.pipeline_mode<synchronous>, transform_indices = @transform_1, window_bounds = array<i64: 2304, 96>}, {pipeline_mode = #tpu.pipeline_mode<synchronous>, transform_indices = @transform_2, window_bounds = array<i64: 1, 96>}, {pipeline_mode = #tpu.pipeline_mode<synchronous>, transform_indices = @transform_3, window_bounds = array<i64: 96, 128>}, {pipeline_mode = #tpu.pipeline_mode<synchronous>, transform_indices = @transform_4, window_bounds = array<i64: 1, 128>}, {transform_indices = @transform_5, window_bounds = array<i64: 8, 128>}]} {
    %c0 = arith.constant 0 : index
    %c0_0 = arith.constant 0 : index
    %0 = vector.load %arg1[%c0, %c0_0] : memref<8x2304xf32, #tpu.memory_space<vmem>>, vector<8x2304xf32>
    %1 = arith.truncf %0 : vector<8x2304xf32> to vector<8x2304xbf16>
    %c0_1 = arith.constant 0 : index
    %c0_2 = arith.constant 0 : index
    %2 = vector.load %arg2[%c0_1, %c0_2] : memref<2304x96xbf16, #tpu.memory_space<vmem>>, vector<2304x96xbf16>
    %cst = arith.constant dense<0.000000e+00> : vector<8x96xf32>
    %3 = tpu.matmul %1, %2, %cst {dimension_numbers = #tpu.dot_dimension_numbers<[1], [0], [0], [1], [0, 0, 1, 1], [], []>} : vector<8x2304xbf16>, vector<2304x96xbf16>, vector<8x96xf32> -> vector<8x96xf32>
    %c0_3 = arith.constant 0 : index
    %c0_4 = arith.constant 0 : index
    %4 = vector.load %arg3[%c0_3, %c0_4] : memref<1x96xf32, #tpu.memory_space<vmem>>, vector<1x96xf32>
    %5 = vector.broadcast %4 : vector<1x96xf32> to vector<8x96xf32>
    %6 = arith.addf %3, %5 : vector<8x96xf32>
    %cst_5 = arith.constant 0.000000e+00 : f32
    %7 = vector.broadcast %cst_5 : f32 to vector<8x96xf32>
    %8 = arith.maximumf %6, %7 : vector<8x96xf32>
    %9 = arith.truncf %8 : vector<8x96xf32> to vector<8x96xbf16>
    %c0_6 = arith.constant 0 : index
    %c0_7 = arith.constant 0 : index
    %10 = vector.load %arg4[%c0_6, %c0_7] : memref<96x128xbf16, #tpu.memory_space<vmem>>, vector<96x128xbf16>
    %cst_8 = arith.constant dense<0.000000e+00> : vector<8x128xf32>
    %11 = tpu.matmul %9, %10, %cst_8 {dimension_numbers = #tpu.dot_dimension_numbers<[1], [0], [0], [1], [0, 0, 1, 1], [], []>} : vector<8x96xbf16>, vector<96x128xbf16>, vector<8x128xf32> -> vector<8x128xf32>
    %c0_9 = arith.constant 0 : index
    %c0_10 = arith.constant 0 : index
    %12 = vector.load %arg5[%c0_9, %c0_10] : memref<1x128xf32, #tpu.memory_space<vmem>>, vector<1x128xf32>
    %13 = vector.broadcast %12 : vector<1x128xf32> to vector<8x128xf32>
    %14 = arith.addf %11, %13 : vector<8x128xf32>
    %c0_11 = arith.constant 0 : index
    %c0_12 = arith.constant 0 : index
    %15 = vector.load %arg6[%c0_11, %c0_12] : memref<8x128xf32, #tpu.memory_space<vmem>>, vector<8x128xf32>
    tpu.vector_store %arg6[%c0_11, %c0_12], %14 {strides = array<i32>} : memref<8x128xf32, #tpu.memory_space<vmem>>, vector<8x128xf32>,
    return
  }
  func.func @transform_0(%arg0: i32) -> (i32, i32) {
    %c0_i32 = arith.constant 0 : i32
    %c0_i32_0 = arith.constant 0 : i32
    return %arg0, %c0_i32 : i32, i32
  }
  func.func @transform_1(%arg0: i32) -> (i32, i32) {
    %c0_i32 = arith.constant 0 : i32
    %c0_i32_0 = arith.constant 0 : i32
    %c0_i32_1 = arith.constant 0 : i32
    return %c0_i32, %c0_i32_0 : i32, i32
  }
  func.func @transform_2(%arg0: i32) -> (i32, i32) {
    %c0_i32 = arith.constant 0 : i32
    %c0_i32_0 = arith.constant 0 : i32
    %c0_i32_1 = arith.constant 0 : i32
    return %c0_i32, %c0_i32_0 : i32, i32
  }
  func.func @transform_3(%arg0: i32) -> (i32, i32) {
    %c0_i32 = arith.constant 0 : i32
    %c0_i32_0 = arith.constant 0 : i32
    %c0_i32_1 = arith.constant 0 : i32
    return %c0_i32, %c0_i32_0 : i32, i32
  }
  func.func @transform_4(%arg0: i32) -> (i32, i32) {
    %c0_i32 = arith.constant 0 : i32
    %c0_i32_0 = arith.constant 0 : i32
    %c0_i32_1 = arith.constant 0 : i32
    return %c0_i32, %c0_i32_0 : i32, i32
  }
  func.func @transform_5(%arg0: i32) -> (i32, i32) {
    %c0_i32 = arith.constant 0 : i32
    %c0_i32_0 = arith.constant 0 : i32
    return %arg0, %c0_i32 : i32, i32
  }
}

</mosaic_0001>

<bundles_post_ra>
// kernel: _kand_core.1
= control target key start
LH: loop header
LB: loop body
LE: loop exit
PB: predicated region body
PF: predicated region fallthrough
CT: control target
= control target key end

     0   :  { %v68_v29 = vlaneseq  ;;  %v2472_v34 = vmov 1983009808   ;;  %vm2474_vm0 = vmmov 0   ;;  %vm1835_vm1 = vcmask 785408   ;;  %s3038_s0 = inlined_call_operand.vmem [shape: f32[2,2304], index: 0, kind: input, shape index: {}]   ;;  %s3039_s1 = inlined_call_operand.vmem [shape: bf16[2304,96], index: 1, kind: input, shape index: {}]   ;;  %s3040_s2 = inlined_call_operand.vmem [shape: f32[1,96], index: 2, kind: input, shape index: {}]   ;;  %s3041_s3 = inlined_call_operand.vmem [shape: bf16[96,128], index: 3, kind: input, shape index: {}]   ;;  %s3042_s4 = inlined_call_operand.vmem [shape: f32[1,128], index: 4, kind: input, shape index: {}]   ;;  %s3043_s5 = inlined_call_operand.vmem [shape: f32[2,128], index: 5, kind: output, shape index: {}]  }
   0x1   :  { %v2296_v0 = vld [vmem:[%s3039_s1 + $0x40] sm:$0xff]   ;;  %v2300_v4 = vld [vmem:[%s3039_s1 + $0x48] sm:$0xff]   ;;  %v2304_v8 = vld [vmem:[%s3039_s1 + $0x50] sm:$0xff]   ;;  %v66_v35 = vunpack.c.l.s4 %v2472_v34 }
   0x2   :  { %v2297_v1 = vld [vmem:[%s3039_s1] sm:$0xff]   ;;  %2072 = vmatprep.subr.bf16.mxu0 %v2296_v0  ;;  %v2301_v5 = vld [vmem:[%s3039_s1 + $0x8] sm:$0xff]   ;;  %v2305_v9 = vld [vmem:[%s3039_s1 + $0x10] sm:$0xff]   ;;  %v69_v36 = vshrl.u32 %v68_v29, 7 }
   0x3   :  { %v2298_v2 = vld [vmem:[%s3039_s1 + $0xc0] sm:$0xff]   ;;  %2073 = vmatpush3.bf16.msra.mxu0 %v2297_v1  ;;  %v2302_v6 = vld [vmem:[%s3039_s1 + $0xc8] sm:$0xff]   ;;  %v2306_v10 = vld [vmem:[%s3039_s1 + $0xd0] sm:$0xff]   ;;  %v67_v38 = vunpack.c.0.s8 %v66_v35 }
   0x4   :  { %v2299_v3 = vld [vmem:[%s3039_s1 + $0x80] sm:$0xff]   ;;  %2094 = vmatprep.subr.bf16.mxu1 %v2298_v2  ;;  %2074 = vmatprep.subr.bf16.mxu0 %v2300_v4  ;;  %v2303_v7 = vld [vmem:[%s3039_s1 + $0x88] sm:$0xff]   ;;  %v2307_v11 = vld [vmem:[%s3039_s1 + $0x90] sm:$0xff]  }
   0x5   :  { %2095 = vmatpush3.bf16.msra.mxu1 %v2299_v3  ;;  %v2308_v12 = vld [vmem:[%s3039_s1 + $0x58] sm:$0xff]   ;;  %v2312_v16 = vld [vmem:[%s3039_s1 + $0x60] sm:$0xff]   ;;  %v2316_v20 = vld [vmem:[%s3039_s1 + $0x68] sm:$0xff]   ;;  %v2616_v42 = vsub.s32 %v67_v38, %v69_v36 }
   0x6   :  { %2096 = vmatprep.subr.bf16.mxu1 %v2302_v6  ;;  %v2309_v13 = vld [vmem:[%s3039_s1 + $0x18] sm:$0xff]   ;;  %v2313_v17 = vld [vmem:[%s3039_s1 + $0x20] sm:$0xff]   ;;  %v2317_v21 = vld [vmem:[%s3039_s1 + $0x28] sm:$0xff]  }
   0x7   :  { %2075 = vmatpush3.bf16.msra.mxu0 %v2301_v5  ;;  %v2310_v14 = vld [vmem:[%s3039_s1 + $0xd8] sm:$0xff]   ;;  %v2314_v18 = vld [vmem:[%s3039_s1 + $0xe0] sm:$0xff]   ;;  %v2318_v22 = vld [vmem:[%s3039_s1 + $0xe8] sm:$0xff]  }
   0x8   :  { %2076 = vmatprep.subr.bf16.mxu0 %v2304_v8  ;;  %v2311_v15 = vld [vmem:[%s3039_s1 + $0x98] sm:$0xff]   ;;  %v2315_v19 = vld [vmem:[%s3039_s1 + $0xa0] sm:$0xff]   ;;  %v2319_v23 = vld [vmem:[%s3039_s1 + $0xa8] sm:$0xff]  }
   0x9   :  { %2097 = vmatpush3.bf16.msra.mxu1 %v2303_v7  ;;  %v2320_v24 = vld [vmem:[%s3039_s1 + $0x70] sm:$0xff]   ;;  %v2324_v28 = vld [vmem:[%s3039_s1 + $0x78] sm:$0xff]   ;;  %v2327_v32 = vld [vmem:[%s3038_s0] ss:$36 sps:$4 sm:$0xff]  }
   0xa   :  { %2098 = vmatprep.subr.bf16.mxu1 %v2306_v10  ;;  %v2321_v25 = vld [vmem:[%s3039_s1 + $0x30] sm:$0xff]   ;;  %v2325_v30 = vld [vmem:[%s3039_s1 + $0x38] sm:$0xff]   ;;  %v2329_v33 = vld [vmem:[%s3038_s0 + $0x48] ss:$36 sps:$4 sm:$0xff]   ;;  %v71_v44 = vrot.slane %v2327_v32, %v2616_v42 }
   0xb   :  { %2077 = vmatpush3.bf16.msra.mxu0 %v2305_v9  ;;  %v2322_v26 = vld [vmem:[%s3039_s1 + $0xf0] sm:$0xff]   ;;  %v2326_v31 = vld [vmem:[%s3039_s1 + $0xf8] sm:$0xff]   ;;  %v2332_v39 = vld [vmem:[%s3039_s1 + $0x140] sm:$0xff]   ;;  %v85_v45 = vrot.slane %v2329_v33, %v2616_v42 }
   0xc   :  { %2078 = vmatprep.subr.bf16.mxu0 %v2308_v12  ;;  %v2323_v27 = vld [vmem:[%s3039_s1 + $0xb0] sm:$0xff]   ;;  %v2331_v37 = vld [vmem:[%s3039_s1 + $0xb8] sm:$0xff]   ;;  %v2333_v40 = vld [vmem:[%s3038_s0 + $0x4] ss:$36 sps:$4 sm:$0xff]  }
   0xd   :  { %2099 = vmatpush3.bf16.msra.mxu1 %v2307_v11  ;;  %v2334_v41 = vld [vmem:[%s3038_s0 + $0x4c] ss:$36 sps:$4 sm:$0xff]   ;;  %v2336_v43 = vld [vmem:[%s3039_s1 + $0x1c0] sm:$0xff]   ;;  %v78_v46 = vrot.slane %v2333_v40, %v2616_v42  ;;  %v94_v48 = vcombine.high %v71_v44, %v85_v45  ;;  %v93_v49 = vcombine.low %v71_v44, %v85_v45  ;;  %v2346_v2 = vld [vmem:[%s3039_s1 + $0x158] sm:$0xff]  }
   0xe   :  { %2100 = vmatprep.subr.bf16.mxu1 %v2310_v14  ;;  %v92_v47 = vrot.slane %v2334_v41, %v2616_v42  ;;  %v2335_v51 = vld [vmem:[%s3039_s1 + $0x100] sm:$0xff]   ;;  %v2338_v58 = vld [vmem:[%s3039_s1 + $0x148] sm:$0xff]   ;;  %v2342_v62 = vld [vmem:[%s3039_s1 + $0x150] sm:$0xff]  }
   0xf   :  { %2079 = vmatpush3.bf16.msra.mxu0 %v2309_v13  ;;  %v2337_v53 = vld [vmem:[%s3039_s1 + $0x180] sm:$0xff]   ;;  %v242_v54 = vpack.c.bf16 %v94_v48, %v94_v48  ;;  %v241_v55 = vpack.c.bf16 %v93_v49, %v93_v49  ;;  %v2340_v59 = vld [vmem:[%s3039_s1 + $0x1c8] sm:$0xff]   ;;  %v2344_v63 = vld [vmem:[%s3039_s1 + $0x1d0] sm:$0xff]  }
  0x10   :  { %2080 = vmatprep.subr.bf16.mxu0 %v2312_v16  ;;  %v96_v50 = vcombine.high %v78_v46, %v92_v47  ;;  %v95_v52 = vcombine.low %v78_v46, %v92_v47  ;;  %v2339_v60 = vld [vmem:[%s3039_s1 + $0x108] sm:$0xff]   ;;  %v2343_v0 = vld [vmem:[%s3039_s1 + $0x110] sm:$0xff]   ;;  %v2348_v3 = vld [vmem:[%s3039_s1 + $0x1d8] sm:$0xff]  }
  0x11   :  { %2101 = vmatpush3.bf16.msra.mxu1 %v2311_v15  ;;  %1450 = vmatprep.mubr.bf16.mxu0 %v242_v54  ;;  %v2341_v61 = vld [vmem:[%s3039_s1 + $0x188] sm:$0xff]   ;;  %v2345_v1 = vld [vmem:[%s3039_s1 + $0x190] sm:$0xff]   ;;  %v2347_v4 = vld [vmem:[%s3039_s1 + $0x118] sm:$0xff]  }
  0x12   :  { %2102 = vmatprep.subr.bf16.mxu1 %v2314_v18  ;;  %v244_v56 = vpack.c.bf16 %v96_v50, %v96_v50  ;;  %v243_v57 = vpack.c.bf16 %v95_v52, %v95_v52  ;;  %v2349_v5 = vld [vmem:[%s3039_s1 + $0x198] sm:$0xff]   ;;  %v2350_v6 = vld [vmem:[%s3039_s1 + $0x160] sm:$0xff]   ;;  %v2354_v10 = vld [vmem:[%s3039_s1 + $0x168] sm:$0xff]  }
  0x13   :  { %2081 = vmatpush3.bf16.msra.mxu0 %v2313_v17  ;;  %v2352_v7 = vld [vmem:[%s3039_s1 + $0x1e0] sm:$0xff]   ;;  %v2356_v11 = vld [vmem:[%s3039_s1 + $0x1e8] sm:$0xff]   ;;  %v2358_v14 = vld [vmem:[%s3039_s1 + $0x170] sm:$0xff]  }
  0x14   :  { %2082 = vmatprep.subr.bf16.mxu0 %v2316_v20  ;;  %1490 = vmatprep.mubr.bf16.mxu1 %v244_v56  ;;  %v2351_v8 = vld [vmem:[%s3039_s1 + $0x120] sm:$0xff]   ;;  %v2355_v12 = vld [vmem:[%s3039_s1 + $0x128] sm:$0xff]   ;;  %v2360_v15 = vld [vmem:[%s3039_s1 + $0x1f0] sm:$0xff]  }
  0x15   :  { %2103 = vmatpush3.bf16.msra.mxu1 %v2315_v19  ;;  %v2353_v9 = vld [vmem:[%s3039_s1 + $0x1a0] sm:$0xff]   ;;  %v2357_v13 = vld [vmem:[%s3039_s1 + $0x1a8] sm:$0xff]   ;;  %v2359_v16 = vld [vmem:[%s3039_s1 + $0x130] sm:$0xff]  }
  0x16   :  { %2104 = vmatprep.subr.bf16.mxu1 %v2318_v22  ;;  %v2361_v17 = vld [vmem:[%s3039_s1 + $0x1b0] sm:$0xff]   ;;  %v2362_v18 = vld [vmem:[%s3039_s1 + $0x178] sm:$0xff]   ;;  %v2365_v20 = vld [vmem:[%s3038_s0 + $0x8] ss:$36 sps:$4 sm:$0xff]  }
  0x17   :  { %2083 = vmatpush3.bf16.msra.mxu0 %v2317_v21  ;;  %v2364_v19 = vld [vmem:[%s3039_s1 + $0x1f8] sm:$0xff]   ;;  %v2367_v21 = vld [vmem:[%s3038_s0 + $0x50] ss:$36 sps:$4 sm:$0xff]   ;;  %v2374_v33 = vld [vmem:[%s3039_s1 + $0x2c0] sm:$0xff]  }
  0x18   :  { %2084 = vmatprep.subr.bf16.mxu0 %v2320_v24  ;;  %v2363_v22 = vld [vmem:[%s3039_s1 + $0x138] sm:$0xff]   ;;  %v121_v24 = vrot.slane %v2367_v21, %v2616_v42  ;;  %v2373_v36 = vld [vmem:[%s3039_s1 + $0x200] sm:$0xff]   ;;  %v2376_v40 = vld [vmem:[%s3039_s1 + $0x248] sm:$0xff]  }
  0x19   :  { %2105 = vmatpush3.bf16.msra.mxu1 %v2319_v23  ;;  %v107_v23 = vrot.slane %v2365_v20, %v2616_v42  ;;  %v2377_v44 = vld [vmem:[%s3039_s1 + $0x208] sm:$0xff]   ;;  %v2380_v47 = vld [vmem:[%s3039_s1 + $0x250] sm:$0xff]   ;;  %v2385_v52 = vld [vmem:[%s3039_s1 + $0x218] sm:$0xff]  }
  0x1a   :  { %2106 = vmatprep.subr.bf16.mxu1 %v2322_v26  ;;  %v2371_v26 = vld [vmem:[%s3038_s0 + $0xc] ss:$36 sps:$4 sm:$0xff]   ;;  %v2387_v54 = vld [vmem:[%s3039_s1 + $0x298] sm:$0xff]   ;;  %v2389_v56 = vld [vmem:[%s3039_s1 + $0x220] sm:$0xff]  }
  0x1b   :  { %2085 = vmatpush3.bf16.msra.mxu0 %v2321_v25  ;;  %v2369_v25 = vld [vmem:[%s3039_s1 + $0x1b8] sm:$0xff]   ;;  %v129_v29 = vcombine.low %v107_v23, %v121_v24  ;;  %v2378_v45 = vld [vmem:[%s3039_s1 + $0x2c8] sm:$0xff]   ;;  %v2381_v48 = vld [vmem:[%s3039_s1 + $0x210] sm:$0xff]  }
  0x1c   :  { %2086 = vmatprep.subr.bf16.mxu0 %v2324_v28  ;;  %v130_v28 = vcombine.high %v107_v23, %v121_v24  ;;  %v2379_v46 = vld [vmem:[%s3039_s1 + $0x288] sm:$0xff]   ;;  %v2382_v49 = vld [vmem:[%s3039_s1 + $0x2d0] sm:$0xff]   ;;  %v2413_v24 = vld [vmem:[%s3039_s1 + $0x380] sm:$0xff]  }
  0x1d   :  { %2107 = vmatpush3.bf16.msra.mxu1 %v2323_v27  ;;  %v2372_v27 = vld [vmem:[%s3038_s0 + $0x54] ss:$36 sps:$4 sm:$0xff]   ;;  %v245_v35 = vpack.c.bf16 %v129_v29, %v129_v29  ;;  %v2416_v29 = vld [vmem:[%s3039_s1 + $0x3c8] sm:$0xff]  }
  0x1e   :  { %2108 = vmatprep.subr.bf16.mxu1 %v2326_v31  ;;  %v114_v31 = vrot.slane %v2371_v26, %v2616_v42  ;;  %v128_v32 = vrot.slane %v2372_v27, %v2616_v42  ;;  %v246_v34 = vpack.c.bf16 %v130_v28, %v130_v28  ;;  %v2383_v50 = vld [vmem:[%s3039_s1 + $0x290] sm:$0xff]   ;;  %v2415_v28 = vld [vmem:[%s3039_s1 + $0x308] sm:$0xff]  }
  0x1f   :  { %2087 = vmatpush3.bf16.msra.mxu0 %v2325_v30  ;;  %v2370_v30 = vld [vmem:[%s3039_s1 + $0x240] sm:$0xff]  }
  0x20   :  { %2116 = vmatprep.subr.bf16.mxu0 %v2332_v39  ;;  %v131_v38 = vcombine.low %v114_v31, %v128_v32  ;;  %v2375_v39 = vld [vmem:[%s3039_s1 + $0x280] sm:$0xff]  }
  0x21   :  { %2109 = vmatpush3.bf16.msra.mxu1 %v2331_v37  ;;  %v132_v37 = vcombine.high %v114_v31, %v128_v32  ;;  %v2418_v31 = vld [vmem:[%s3039_s1 + $0x350] sm:$0xff]  }
  0x22   :  { %2138 = vmatprep.subr.bf16.mxu1 %v2336_v43  ;;  %1451 = vmatmul.mubr.bf16.vlgmr.msra.gmra.mrb[0].mxu0 %v241_v55  ;;  %v247_v43 = vpack.c.bf16 %v131_v38, %v131_v38  ;;  %v2388_v55 = vld [vmem:[%s3039_s1 + $0x260] sm:$0xff]   ;;  %v2419_v32 = vld [vmem:[%s3039_s1 + $0x310] sm:$0xff]   ;;  %v2425_v38 = vld [vmem:[%s3039_s1 + $0x398] sm:$0xff]  }
  0x23   :  { %2117 = vmatpush3.bf16.msra.mxu0 %v2335_v51  ;;  %1530 = vmatprep.mubr.bf16.mxu0 %v246_v34  ;;  %v248_v41 = vpack.c.bf16 %v132_v37, %v132_v37  ;;  %v2384_v51 = vld [vmem:[%s3039_s1 + $0x258] sm:$0xff]   ;;  %v2421_v34 = vld [vmem:[%s3039_s1 + $0x390] sm:$0xff]  }
  0x24   :  { %1491 = vmatmul.mubr.bf16.vlgmr.msra.gmra.mrb[0].mxu1 %v243_v57  ;;  %2118 = vmatprep.subr.bf16.mxu0 %v2338_v58  ;;  %v2390_v57 = vld [vmem:[%s3039_s1 + $0x2e0] sm:$0xff]   ;;  %v2424_v37 = vld [vmem:[%s3039_s1 + $0x3d8] sm:$0xff]  }
  0x25   :  { %2139 = vmatpush3.bf16.msra.mxu1 %v2337_v53  ;;  %1570 = vmatprep.mubr.bf16.mxu1 %v248_v41  ;;  %v2386_v53 = vld [vmem:[%s3039_s1 + $0x2d8] sm:$0xff]   ;;  %v2391_v58 = vld [vmem:[%s3039_s1 + $0x2a0] sm:$0xff]  }
  0x26   :  { %2140 = vmatprep.subr.bf16.mxu1 %v2340_v59  ;;  %v2392_v59 = vld [vmem:[%s3039_s1 + $0x268] sm:$0xff]   ;;  %v2428_v41 = vld [vmem:[%s3039_s1 + $0x3e0] sm:$0xff]  }
  0x27   :  { %2119 = vmatpush3.bf16.msra.mxu0 %v2339_v60  ;;  %v2393_v60 = vld [vmem:[%s3039_s1 + $0x228] sm:$0xff]  }
  0x28   :  { %2120 = vmatprep.subr.bf16.mxu0 %v2342_v62  ;;  %v2395_v62 = vld [vmem:[%s3039_s1 + $0x2a8] sm:$0xff]  }
  0x29   :  { %2141 = vmatpush3.bf16.msra.mxu1 %v2341_v61  ;;  %v2394_v61 = vld [vmem:[%s3039_s1 + $0x2e8] sm:$0xff]  }
  0x2a   :  { %2142 = vmatprep.subr.bf16.mxu1 %v2344_v63  ;;  %v2396_v63 = vld [vmem:[%s3039_s1 + $0x270] sm:$0xff]  }
  0x2b   :  { %2121 = vmatpush3.bf16.msra.mxu0 %v2343_v0  ;;  %v2397_v0 = vld [vmem:[%s3039_s1 + $0x230] sm:$0xff]  }
  0x2c   :  { %2122 = vmatprep.subr.bf16.mxu0 %v2346_v2  ;;  %v2399_v2 = vld [vmem:[%s3039_s1 + $0x2b0] sm:$0xff]  }
  0x2d   :  { %2143 = vmatpush3.bf16.msra.mxu1 %v2345_v1  ;;  %v2398_v1 = vld [vmem:[%s3039_s1 + $0x2f0] sm:$0xff]  }
  0x2e   :  { %2144 = vmatprep.subr.bf16.mxu1 %v2348_v3  ;;  %v2400_v3 = vld [vmem:[%s3039_s1 + $0x278] sm:$0xff]  }
  0x2f   :  { %2123 = vmatpush3.bf16.msra.mxu0 %v2347_v4  ;;  %v2401_v4 = vld [vmem:[%s3039_s1 + $0x238] sm:$0xff]  }
  0x30   :  { %2124 = vmatprep.subr.bf16.mxu0 %v2350_v6  ;;  %v2403_v6 = vld [vmem:[%s3038_s0 + $0x10] ss:$36 sps:$4 sm:$0xff]  }
  0x31   :  { %2145 = vmatpush3.bf16.msra.mxu1 %v2349_v5  ;;  %v2402_v5 = vld [vmem:[%s3039_s1 + $0x2f8] sm:$0xff]  }
  0x32   :  { %2146 = vmatprep.subr.bf16.mxu1 %v2352_v7  ;;  %v2405_v7 = vld [vmem:[%s3038_s0 + $0x58] ss:$36 sps:$4 sm:$0xff]  }
  0x33   :  { %2125 = vmatpush3.bf16.msra.mxu0 %v2351_v8  ;;  %v143_v8 = vrot.slane %v2403_v6, %v2616_v42 }
  0x34   :  { %2126 = vmatprep.subr.bf16.mxu0 %v2354_v10  ;;  %v157_v10 = vrot.slane %v2405_v7, %v2616_v42 }
  0x35   :  { %2147 = vmatpush3.bf16.msra.mxu1 %v2353_v9  ;;  %v2407_v9 = vld [vmem:[%s3039_s1 + $0x2b8] sm:$0xff]  }
  0x36   :  { %2148 = vmatprep.subr.bf16.mxu1 %v2356_v11  ;;  %v2408_v11 = vld [vmem:[%s3039_s1 + $0x340] sm:$0xff]  }
  0x37   :  { %2127 = vmatpush3.bf16.msra.mxu0 %v2355_v12  ;;  %v2409_v12 = vld [vmem:[%s3038_s0 + $0x14] ss:$36 sps:$4 sm:$0xff]  }
  0x38   :  { %2128 = vmatprep.subr.bf16.mxu0 %v2358_v14  ;;  %v166_v14 = vcombine.high %v143_v8, %v157_v10 }
  0x39   :  { %2149 = vmatpush3.bf16.msra.mxu1 %v2357_v13  ;;  %v2410_v13 = vld [vmem:[%s3038_s0 + $0x5c] ss:$36 sps:$4 sm:$0xff]  }
  0x3a   :  { %2150 = vmatprep.subr.bf16.mxu1 %v2360_v15  ;;  %v165_v15 = vcombine.low %v143_v8, %v157_v10  ;;  %v250_v20 = vpack.c.bf16 %v166_v14, %v166_v14  ;;  %v2450_v8 = vld [vmem:[%s3039_s1 + $0x448] sm:$0xff]   ;;  %v2454_v14 = vld [vmem:[%s3039_s1 + $0x458] sm:$0xff]  }
  0x3b   :  { %2129 = vmatpush3.bf16.msra.mxu0 %v2359_v16  ;;  %v150_v16 = vrot.slane %v2409_v12, %v2616_v42  ;;  %v2452_v12 = vld [vmem:[%s3039_s1 + $0x450] sm:$0xff]  }
  0x3c   :  { %2130 = vmatprep.subr.bf16.mxu0 %v2362_v18  ;;  %v2412_v18 = vld [vmem:[%s3039_s1 + $0x3c0] sm:$0xff]   ;;  %v249_v21 = vpack.c.bf16 %v165_v15, %v165_v15  ;;  %v2455_v15 = vld [vmem:[%s3039_s1 + $0x418] sm:$0xff]  }
  0x3d   :  { %2151 = vmatpush3.bf16.msra.mxu1 %v2361_v17  ;;  %v164_v17 = vrot.slane %v2410_v13, %v2616_v42  ;;  %v2453_v13 = vld [vmem:[%s3039_s1 + $0x410] sm:$0xff]  }
  0x3e   :  { %2152 = vmatprep.subr.bf16.mxu1 %v2364_v19  ;;  %v2411_v19 = vld [vmem:[%s3039_s1 + $0x300] sm:$0xff]  }
  0x3f   :  { %2131 = vmatpush3.bf16.msra.mxu0 %v2363_v22  ;;  %v168_v22 = vcombine.high %v150_v16, %v164_v17  ;;  %v167_v23 = vcombine.low %v150_v16, %v164_v17  ;;  %v2456_v16 = vld [vmem:[%s3039_s1 + $0x460] sm:$0xff]  }
  0x40   :  { %2160 = vmatprep.subr.bf16.mxu0 %v2370_v30  ;;  %v2417_v30 = vld [vmem:[%s3039_s1 + $0x388] sm:$0xff]   ;;  %v2457_v17 = vld [vmem:[%s3039_s1 + $0x420] sm:$0xff]  }
  0x41   :  { %2153 = vmatpush3.bf16.msra.mxu1 %v2369_v25  ;;  %v2414_v25 = vld [vmem:[%s3039_s1 + $0x348] sm:$0xff]   ;;  %v252_v26 = vpack.c.bf16 %v168_v22, %v168_v22  ;;  %v251_v27 = vpack.c.bf16 %v167_v23, %v167_v23 }
  0x42   :  { %2182 = vmatprep.subr.bf16.mxu1 %v2374_v33  ;;  %1531 = vmatmul.mubr.bf16.vlgmr.msra.gmra.mrb[4].mxu0 %v245_v35  ;;  %v2420_v33 = vld [vmem:[%s3039_s1 + $0x3d0] sm:$0xff]   ;;  %v2422_v35 = vld [vmem:[%s3039_s1 + $0x358] sm:$0xff]  }
  0x43   :  { %2161 = vmatpush3.bf16.msra.mxu0 %v2373_v36  ;;  %1610 = vmatprep.mubr.bf16.mxu0 %v250_v20  ;;  %v2423_v36 = vld [vmem:[%s3039_s1 + $0x318] sm:$0xff]   ;;  %v2458_v20 = vld [vmem:[%s3039_s1 + $0x468] sm:$0xff]  }
  0x44   :  { %1571 = vmatmul.mubr.bf16.vlgmr.msra.gmra.mrb[4].mxu1 %v247_v43  ;;  %2162 = vmatprep.subr.bf16.mxu0 %v2376_v40  ;;  %v2427_v40 = vld [vmem:[%s3039_s1 + $0x320] sm:$0xff]  }
  0x45   :  { %2183 = vmatpush3.bf16.msra.mxu1 %v2375_v39  ;;  %1650 = vmatprep.mubr.bf16.mxu1 %v252_v26  ;;  %v2426_v39 = vld [vmem:[%s3039_s1 + $0x360] sm:$0xff]   ;;  %v2460_v26 = vld [vmem:[%s3039_s1 + $0x470] sm:$0xff]  }
  0x46   :  { %2184 = vmatprep.subr.bf16.mxu1 %v2378_v45  ;;  %v2429_v43 = vld [vmem:[%s3039_s1 + $0x3a0] sm:$0xff]   ;;  %v2431_v45 = vld [vmem:[%s3039_s1 + $0x328] sm:$0xff]  }
  0x47   :  { %2163 = vmatpush3.bf16.msra.mxu0 %v2377_v44  ;;  %v2430_v44 = vld [vmem:[%s3039_s1 + $0x368] sm:$0xff]  }
  0x48   :  { %2164 = vmatprep.subr.bf16.mxu0 %v2380_v47  ;;  %v2433_v47 = vld [vmem:[%s3039_s1 + $0x3a8] sm:$0xff]  }
  0x49   :  { %2185 = vmatpush3.bf16.msra.mxu1 %v2379_v46  ;;  %v2432_v46 = vld [vmem:[%s3039_s1 + $0x3e8] sm:$0xff]  }
  0x4a   :  { %2186 = vmatprep.subr.bf16.mxu1 %v2382_v49  ;;  %v2435_v49 = vld [vmem:[%s3039_s1 + $0x330] sm:$0xff]  }
  0x4b   :  { %2165 = vmatpush3.bf16.msra.mxu0 %v2381_v48  ;;  %v2434_v48 = vld [vmem:[%s3039_s1 + $0x370] sm:$0xff]  }
  0x4c   :  { %2166 = vmatprep.subr.bf16.mxu0 %v2384_v51  ;;  %v2437_v51 = vld [vmem:[%s3039_s1 + $0x3b0] sm:$0xff]  }
  0x4d   :  { %2187 = vmatpush3.bf16.msra.mxu1 %v2383_v50  ;;  %v2436_v50 = vld [vmem:[%s3039_s1 + $0x3f0] sm:$0xff]  }
  0x4e   :  { %2188 = vmatprep.subr.bf16.mxu1 %v2386_v53  ;;  %v2439_v53 = vld [vmem:[%s3039_s1 + $0x338] sm:$0xff]  }
  0x4f   :  { %2167 = vmatpush3.bf16.msra.mxu0 %v2385_v52  ;;  %v2438_v52 = vld [vmem:[%s3039_s1 + $0x378] sm:$0xff]  }
  0x50   :  { %2168 = vmatprep.subr.bf16.mxu0 %v2388_v55  ;;  %v2441_v55 = vld [vmem:[%s3038_s0 + $0x18] ss:$36 sps:$4 sm:$0xff]  }
  0x51   :  { %2189 = vmatpush3.bf16.msra.mxu1 %v2387_v54  ;;  %v2440_v54 = vld [vmem:[%s3039_s1 + $0x3f8] sm:$0xff]  }
  0x52   :  { %2190 = vmatprep.subr.bf16.mxu1 %v2390_v57  ;;  %v2445_v57 = vld [vmem:[%s3039_s1 + $0x3b8] sm:$0xff]  }
  0x53   :  { %2169 = vmatpush3.bf16.msra.mxu0 %v2389_v56  ;;  %v2443_v56 = vld [vmem:[%s3038_s0 + $0x60] ss:$36 sps:$4 sm:$0xff]  }
  0x54   :  { %2170 = vmatprep.subr.bf16.mxu0 %v2392_v59  ;;  %v193_v59 = vrot.slane %v2443_v56, %v2616_v42 }
  0x55   :  { %2191 = vmatpush3.bf16.msra.mxu1 %v2391_v58  ;;  %v179_v58 = vrot.slane %v2441_v55, %v2616_v42 }
  0x56   :  { %2192 = vmatprep.subr.bf16.mxu1 %v2394_v61  ;;  %v2447_v61 = vld [vmem:[%s3038_s0 + $0x1c] ss:$36 sps:$4 sm:$0xff]  }
  0x57   :  { %2171 = vmatpush3.bf16.msra.mxu0 %v2393_v60  ;;  %v2446_v60 = vld [vmem:[%s3039_s1 + $0x440] sm:$0xff]  }
  0x58   :  { %2172 = vmatprep.subr.bf16.mxu0 %v2396_v63  ;;  %v202_v63 = vcombine.high %v179_v58, %v193_v59 }
  0x59   :  { %2193 = vmatpush3.bf16.msra.mxu1 %v2395_v62  ;;  %v2448_v62 = vld [vmem:[%s3038_s0 + $0x64] ss:$36 sps:$4 sm:$0xff]  }
  0x5a   :  { %2194 = vmatprep.subr.bf16.mxu1 %v2398_v1  ;;  %v186_v1 = vrot.slane %v2447_v61, %v2616_v42 }
  0x5b   :  { %2173 = vmatpush3.bf16.msra.mxu0 %v2397_v0  ;;  %v201_v0 = vcombine.low %v179_v58, %v193_v59 }
  0x5c   :  { %2174 = vmatprep.subr.bf16.mxu0 %v2400_v3  ;;  %v254_v3 = vpack.c.bf16 %v202_v63, %v202_v63 }
  0x5d   :  { %2195 = vmatpush3.bf16.msra.mxu1 %v2399_v2  ;;  %v200_v2 = vrot.slane %v2448_v62, %v2616_v42 }
  0x5e   :  { %2196 = vmatprep.subr.bf16.mxu1 %v2402_v5  ;;  %v2449_v5 = vld [vmem:[%s3039_s1 + $0x400] sm:$0xff]  }
  0x5f   :  { %2175 = vmatpush3.bf16.msra.mxu0 %v2401_v4  ;;  %v253_v4 = vpack.c.bf16 %v201_v0, %v201_v0  ;;  %v204_v6 = vcombine.high %v186_v1, %v200_v2  ;;  %v203_v7 = vcombine.low %v186_v1, %v200_v2 }
  0x60   :  { %2204 = vmatprep.subr.bf16.mxu0 %v2408_v11  ;;  %v2451_v11 = vld [vmem:[%s3039_s1 + $0x408] sm:$0xff]  }
  0x61   :  { %2197 = vmatpush3.bf16.msra.mxu1 %v2407_v9  ;;  %v256_v9 = vpack.c.bf16 %v204_v6, %v204_v6  ;;  %v255_v10 = vpack.c.bf16 %v203_v7, %v203_v7 }
  0x62   :  { %2226 = vmatprep.subr.bf16.mxu1 %v2412_v18  ;;  %1611 = vmatmul.mubr.bf16.vlgmr.msra.gmra.mrb[8].mxu0 %v249_v21  ;;  %v2464_v18 = vld [vmem:[%s3038_s0 + $0x20] ss:$36 sps:$4 sm:$0xff]  }
  0x63   :  { %2205 = vmatpush3.bf16.msra.mxu0 %v2411_v19  ;;  %1690 = vmatprep.mubr.bf16.mxu0 %v254_v3  ;;  %v2465_v19 = vld [vmem:[%s3038_s0 + $0x68] ss:$36 sps:$4 sm:$0xff]   ;;  %v213_v21 = vrot.slane %v2464_v18, %v2616_v42 }
  0x64   :  { %1651 = vmatmul.mubr.bf16.vlgmr.msra.gmra.mrb[8].mxu1 %v251_v27  ;;  %2206 = vmatprep.subr.bf16.mxu0 %v2414_v25  ;;  %v220_v22 = vrot.slane %v2465_v19, %v2616_v42  ;;  %v2461_v27 = vld [vmem:[%s3039_s1 + $0x430] sm:$0xff]   ;;  %v2462_v42 = vld [vmem:[%s3039_s1 + $0x478] sm:$0xff]  }
  0x65   :  { %2227 = vmatpush3.bf16.msra.mxu1 %v2413_v24  ;;  %1730 = vmatprep.mubr.bf16.mxu1 %v256_v9  ;;  %v2459_v24 = vld [vmem:[%s3039_s1 + $0x428] sm:$0xff]  }
  0x66   :  { %2228 = vmatprep.subr.bf16.mxu1 %v2416_v29  ;;  %v222_v23 = vcombine.high %v213_v21, %v220_v22  ;;  %v2463_v29 = vld [vmem:[%s3039_s1 + $0x438] sm:$0xff]  }
  0x67   :  { %2207 = vmatpush3.bf16.msra.mxu0 %v2415_v28  ;;  %v221_v28 = vcombine.low %v213_v21, %v220_v22 }
  0x68   :  { %2208 = vmatprep.subr.bf16.mxu0 %v2418_v31  ;;  %v258_v25 = vpack.c.bf16 %v222_v23, %v222_v23  ;;  %v2466_v31 = vld [vmem:[%s3041_s3] sm:$0xff]  }
  0x69   :  { %2229 = vmatpush3.bf16.msra.mxu1 %v2417_v30  ;;  %v257_v30 = vpack.c.bf16 %v221_v28, %v221_v28 }
  0x6a   :  { %2230 = vmatprep.subr.bf16.mxu1 %v2420_v33  ;;  %v2467_v33 = vld [vmem:[%s3041_s3 + $0x8] sm:$0xff]  }
  0x6b   :  { %2209 = vmatpush3.bf16.msra.mxu0 %v2419_v32  ;;  %v2473_v32 = vmov 0.0  }
  0x6c   :  { %2210 = vmatprep.subr.bf16.mxu0 %v2422_v35  ;;  %v2469_v35 = vld [vmem:[%s3041_s3 + $0x18] sm:$0xff]  }
  0x6d   :  { %2231 = vmatpush3.bf16.msra.mxu1 %v2421_v34  ;;  %v2468_v34 = vld [vmem:[%s3041_s3 + $0x10] sm:$0xff]  }
  0x6e   :  { %2232 = vmatprep.subr.bf16.mxu1 %v2424_v37 }
  0x6f   :  { %2211 = vmatpush3.bf16.msra.mxu0 %v2423_v36 }
  0x70   :  { %2212 = vmatprep.subr.bf16.mxu0 %v2426_v39 }
  0x71   :  { %2233 = vmatpush3.bf16.msra.mxu1 %v2425_v38  ;;  %v1919_v38 = vld [vmem:[%s3040_s2] ss:$0 sm:$0xff] }
  0x72   :  { %2234 = vmatprep.subr.bf16.mxu1 %v2428_v41 }
  0x73   :  { %2213 = vmatpush3.bf16.msra.mxu0 %v2427_v40 }
  0x74   :  { %2214 = vmatprep.subr.bf16.mxu0 %v2430_v44 }
  0x75   :  { %2235 = vmatpush3.bf16.msra.mxu1 %v2429_v43 }
  0x76   :  { %2236 = vmatprep.subr.bf16.mxu1 %v2432_v46 }
  0x77   :  { %2215 = vmatpush3.bf16.msra.mxu0 %v2431_v45 }
  0x78   :  { %2216 = vmatprep.subr.bf16.mxu0 %v2434_v48 }
  0x79   :  { %2237 = vmatpush3.bf16.msra.mxu1 %v2433_v47 }
  0x7a   :  { %2238 = vmatprep.subr.bf16.mxu1 %v2436_v50  ;;  %v2470_v50 = vld [vmem:[%s3041_s3 + $0x20] sm:$0xff]  }
  0x7b   :  { %2217 = vmatpush3.bf16.msra.mxu0 %v2435_v49 }
  0x7c   :  { %2218 = vmatprep.subr.bf16.mxu0 %v2438_v52 }
  0x7d   :  { %2239 = vmatpush3.bf16.msra.mxu1 %v2437_v51  ;;  %v2471_v51 = vld [vmem:[%s3041_s3 + $0x28] sm:$0xff]  }
  0x7e   :  { %2240 = vmatprep.subr.bf16.mxu1 %v2440_v54 }
  0x7f   :  { %2219 = vmatpush3.bf16.msra.mxu0 %v2439_v53 }
  0x80   :  { %2248 = vmatprep.subr.bf16.mxu0 %v2446_v60 }
  0x81   :  { %2241 = vmatpush3.bf16.msra.mxu1 %v2445_v57 }
  0x82   :  { %1691 = vmatmul.mubr.bf16.vlgmr.msra.gmra.mrb[12].mxu0 %v253_v4  ;;  %2277 = vmatprep.subr.bf16.mxu1 %v2473_v32 }
  0x83   :  { %2249 = vmatpush3.bf16.msra.mxu0 %v2449_v5  ;;  %1770 = vmatprep.mubr.bf16.mxu0 %v258_v25 }
  0x84   :  { %2250 = vmatprep.subr.bf16.mxu0 %v2450_v8  ;;  %1731 = vmatmul.mubr.bf16.vlgmr.msra.gmra.mrb[12].mxu1 %v255_v10 }
  0x85   :  { %2278 = vmatpush3.bf16.msra.mxu1 %v2466_v31  ;;  %2289 = vmatprep.mubr.msk.bf16.mxu1 %vm2474_vm0, %v2473_v32  ;;  %v2064_v31 = vld [vmem:[%s3042_s4] ss:$0 sm:$0xff] }
  0x86   :  { %2279 = vmatprep.subr.bf16.mxu1 %v2473_v32 }
  0x87   :  { %2251 = vmatpush3.bf16.msra.mxu0 %v2451_v11 }
  0x88   :  { %2252 = vmatprep.subr.bf16.mxu0 %v2452_v12 }
  0x89   :  { %2280 = vmatpush3.bf16.msra.mxu1 %v2467_v33 }
  0x8a   :  { %2281 = vmatprep.subr.bf16.mxu1 %v2473_v32 }
  0x8b   :  { %2253 = vmatpush3.bf16.msra.mxu0 %v2453_v13 }
  0x8c   :  { %2254 = vmatprep.subr.bf16.mxu0 %v2454_v14 }
  0x8d   :  { %2282 = vmatpush3.bf16.msra.mxu1 %v2468_v34 }
  0x8e   :  { %2283 = vmatprep.subr.bf16.mxu1 %v2473_v32 }
  0x8f   :  { %2255 = vmatpush3.bf16.msra.mxu0 %v2455_v15 }
  0x90   :  { %2256 = vmatprep.subr.bf16.mxu0 %v2456_v16 }
  0x91   :  { %2284 = vmatpush3.bf16.msra.mxu1 %v2469_v35 }
  0x92   :  { %2285 = vmatprep.subr.bf16.mxu1 %v2473_v32 }
  0x93   :  { %2257 = vmatpush3.bf16.msra.mxu0 %v2457_v17 }
  0x94   :  { %2258 = vmatprep.subr.bf16.mxu0 %v2458_v20 }
  0x95   :  { %2286 = vmatpush3.bf16.msra.mxu1 %v2470_v50 }
  0x96   :  { %2287 = vmatprep.subr.bf16.mxu1 %v2473_v32 }
  0x97   :  { %2259 = vmatpush3.bf16.msra.mxu0 %v2459_v24 }
  0x98   :  { %2260 = vmatprep.subr.bf16.mxu0 %v2460_v26 }
  0x99   :  { %2288 = vmatpush3.bf16.msra.mxu1 %v2471_v51 }
  0x9b   :  { %2261 = vmatpush3.bf16.msra.mxu0 %v2461_v27 }
  0x9c   :  { %2262 = vmatprep.subr.bf16.mxu0 %v2462_v42 }
  0x9f   :  { %2263 = vmatpush3.bf16.msra.mxu0 %v2463_v29 }
  0xa2   :  { %1771 = vmatmul.mubr.bf16.vlgmr.msra.gmra.mrb[16].mxu0 %v257_v30 }
  0xf5   :  { %v2088_v36 = vpop.f32.mrb[0].mxu0 }
  0xf6   :  { %v2089_v39 = vpop.f32.mrb[1].mxu0 }
  0xf7   :  { %v2110_v37 = vpop.f32.mrb[0].mxu1  ;;  %v2090_v41 = vadd.f32 %v2089_v39, %v2088_v36  ;;  %v2091_v43 = vpop.f32.mrb[2].mxu0 }
  0xf8   :  { %v2111_v40 = vpop.f32.mrb[1].mxu1  ;;  %v2092_v46 = vpop.f32.mrb[3].mxu0 }
  0xf9   :  { %v2112_v44 = vadd.f32 %v2111_v40, %v2110_v37  ;;  %v2113_v45 = vpop.f32.mrb[2].mxu1  ;;  %v1453_v48 = vadd.f32 %v2090_v41, %v1919_v38 }
  0xfa   :  { %v2114_v47 = vpop.f32.mrb[3].mxu1 }
  0xfb   :  { %v1493_v49 = vadd.f32 %v2112_v44, %v1453_v48 }
 0x115   :  { %v2132_v52 = vpop.f32.mrb[4].mxu0 }
 0x116   :  { %v2133_v53 = vpop.f32.mrb[5].mxu0 }
 0x117   :  { %v2134_v54 = vadd.f32 %v2133_v53, %v2132_v52  ;;  %v2135_v55 = vpop.f32.mrb[6].mxu0  ;;  %v2154_v56 = vpop.f32.mrb[4].mxu1 }
 0x118   :  { %v2136_v57 = vpop.f32.mrb[7].mxu0  ;;  %v2155_v58 = vpop.f32.mrb[5].mxu1 }
 0x119   :  { %v1533_v59 = vadd.f32 %v2134_v54, %v1493_v49  ;;  %v2156_v60 = vadd.f32 %v2155_v58, %v2154_v56  ;;  %v2157_v61 = vpop.f32.mrb[6].mxu1 }
 0x11a   :  { %v2158_v62 = vpop.f32.mrb[7].mxu1 }
 0x11b   :  { %v1573_v63 = vadd.f32 %v2156_v60, %v1533_v59 }
 0x135   :  { %v2176_v0 = vpop.f32.mrb[8].mxu0 }
 0x136   :  { %v2177_v1 = vpop.f32.mrb[9].mxu0 }
 0x137   :  { %v2178_v2 = vadd.f32 %v2177_v1, %v2176_v0  ;;  %v2179_v3 = vpop.f32.mrb[10].mxu0  ;;  %v2198_v4 = vpop.f32.mrb[8].mxu1 }
 0x138   :  { %v2180_v5 = vpop.f32.mrb[11].mxu0  ;;  %v2199_v6 = vpop.f32.mrb[9].mxu1 }
 0x139   :  { %v1613_v7 = vadd.f32 %v2178_v2, %v1573_v63  ;;  %v2200_v8 = vadd.f32 %v2199_v6, %v2198_v4  ;;  %v2201_v9 = vpop.f32.mrb[10].mxu1 }
 0x13a   :  { %v2202_v10 = vpop.f32.mrb[11].mxu1 }
 0x13b   :  { %v1653_v11 = vadd.f32 %v2200_v8, %v1613_v7 }
 0x155   :  { %v2220_v12 = vpop.f32.mrb[12].mxu0 }
 0x156   :  { %v2221_v13 = vpop.f32.mrb[13].mxu0 }
 0x157   :  { %v2222_v14 = vadd.f32 %v2221_v13, %v2220_v12  ;;  %v2223_v15 = vpop.f32.mrb[14].mxu0  ;;  %v2242_v16 = vpop.f32.mrb[12].mxu1 }
 0x158   :  { %v2224_v17 = vpop.f32.mrb[15].mxu0  ;;  %v2243_v19 = vpop.f32.mrb[13].mxu1 }
 0x159   :  { %v1693_v18 = vadd.f32 %v2222_v14, %v1653_v11  ;;  %v2244_v20 = vadd.f32 %v2243_v19, %v2242_v16  ;;  %v2245_v21 = vpop.f32.mrb[14].mxu1 }
 0x15a   :  { %v2246_v22 = vpop.f32.mrb[15].mxu1 }
 0x15b   :  { %v1733_v23 = vadd.f32 %v2244_v20, %v1693_v18 }
 0x175   :  { %v2264_v24 = vpop.f32.mrb[16].mxu0 }
 0x176   :  { %v2265_v25 = vpop.f32.mrb[17].mxu0 }
 0x177   :  { %v2266_v26 = vadd.f32 %v2265_v25, %v2264_v24  ;;  %v2267_v27 = vpop.f32.mrb[18].mxu0 }
 0x178   :  { %v2268_v42 = vpop.f32.mrb[19].mxu0 }
 0x179   :  { %v1773_v28 = vadd.f32 %v2266_v26, %v1733_v23 }
 0x17b   :  { %v1778_v29 = vmax.f32 %v1773_v28, 0.0 }
 0x17d   :  { %v1779_v30 = vpack.c.bf16 %v1778_v29, %v1778_v29 }
 0x17f   :  { %2290 = vmatmul.mubr.msk.bf16.vlgmr.msra.gmra.mrb[16].mxu1 %vm1835_vm1, %v1779_v30 }
 0x252   :  { %v1873_v32 = vpop.f32.mrb[16].mxu1 }
 0x253   :  { %v1874_v33 = vadd.f32 %v2064_v31, %v1873_v32  ;;  %v2291_v34 = vpop.f32.mrb[17].mxu1 }
 0x254   :  { %v1876_v35 = vpop.f32.mrb[18].mxu1 }
 0x255   :  { %1879 = vst [vmem:[#allocation2] sm:$0xff] %v1874_v33  ;;  %v2292_v36 = vpop.f32.mrb[19].mxu1 }
 0x25c   :  { %v1897_v37 = vld [vmem:[#allocation2] sm:$0x3] }
 0x25d   :  { %1898 = vst [vmem:[%s3043_s5] sm:$0x3] %v1897_v37 }

</bundles_post_ra>
